<compile_context>
chip_gen: v7x
topology: tpu7x:2x2x1
jax: 0.10.0
libtpu: 0.0.40
codegen_flags: <defaults>
</compile_context>

<pallas_src>
import functools

import jax
import jax.numpy as jnp
from jax.experimental import pallas as pl
from jax.experimental.pallas import tpu as pltpu


_LANE = 128
_SUBLANE = 8
_TARGET_TILE_BYTES = 4 * 1024 * 1024   # per-buffer tile target (v7x-friendly, fine on v5e/v6e)
_VMEM_LIMIT_BYTES = 48 * 1024 * 1024   # explicit scoped-VMEM limit; 6x tile << 64 MiB (v7x)
_MIN_GRID_STEPS = 4                    # keep both v7x TensorCores fed
_COLS_CANDIDATES = (16384, 8192, 4096, 2048, 1024, 512, 256, 128)  # widest first


# ---------------------------------------------------------------------------
# Kernels
# ---------------------------------------------------------------------------

def _residual_add_kernel(y_ref, x_ref, o_ref, *, module_factor, input_factor):
    # o = module(x) * module_factor + x * input_factor, with y = module(x)
    # precomputed outside the kernel (arbitrary wrapped submodule).
    # Inputs are loaded in their native dtypes; combine in f32; cast at store.
    y = y_ref[...].astype(jnp.float32)
    x = x_ref[...].astype(jnp.float32)
    o_ref[...] = (y * module_factor + x * input_factor).astype(o_ref.dtype)


def _residual_fused_kernel(x_ref, o_ref, *, module_fn, module_factor, input_factor):
    # Pointwise wrapped module fused into the residual combine:
    # single HBM read of x, single HBM write of o.
    x = x_ref[...]
    y = module_fn(x).astype(jnp.float32)
    o_ref[...] = (y * module_factor + x.astype(jnp.float32) * input_factor).astype(o_ref.dtype)


# ---------------------------------------------------------------------------
# Tiling helpers
# ---------------------------------------------------------------------------

def _lane_dense_view(n):
    """Pick (rows, cols, n_pad) for a lane-dense 2-D view of a flat length-n array.

    Prefers wide cols (long contiguous HBM runs).  If no candidate divides n
    exactly, pads to the widest cols whose padding overhead is <= ~1.6%,
    otherwise to a multiple of 128 (minimal waste).
    """
    for cols in _COLS_CANDIDATES:
        if n >= cols and n % cols == 0:
            return n // cols, cols, n
    for cols in _COLS_CANDIDATES:
        n_pad = -(-n // cols) * cols
        if (n_pad - n) * 64 <= n_pad:
            return n_pad // cols, cols, n_pad
    cols = _LANE
    n_pad = -(-n // cols) * cols
    return n_pad // cols, cols, n_pad


def _row_tile(rows, cols, max_itemsize, align):
    """Row-block size targeting ~_TARGET_TILE_BYTES/buffer, dtype-aware alignment,
    and >= _MIN_GRID_STEPS grid steps when there is room (v7x megacore)."""
    bytes_per_row = cols * max_itemsize
    tr = max(1, _TARGET_TILE_BYTES // bytes_per_row)
    if rows >= _MIN_GRID_STEPS * align:
        tr = min(tr, rows // _MIN_GRID_STEPS)
    if tr >= rows:
        return rows                                  # full extent (always legal)
    tr = max(align, (tr // align) * align)           # multiple of packed sublane tile
    return min(tr, rows)


def _pallas_elementwise_call(kernel, inputs, out_dtype):
    """Run an elementwise kernel over same-shaped inputs with large lane-dense tiles."""
    shape = inputs[0].shape
    n = inputs[0].size
    if n == 0:
        return jnp.zeros(shape, out_dtype)

    dtypes = [jnp.dtype(a.dtype) for a in inputs] + [jnp.dtype(out_dtype)]
    min_item = min(d.itemsize for d in dtypes)
    max_item = max(d.itemsize for d in dtypes)
    pack = max(1, 4 // min_item)         # rows packed per sublane for narrowest dtype
    align = _SUBLANE * pack              # 8 (f32), 16 (bf16), 32 (int8/fp8)

    rows, cols, n_pad = _lane_dense_view(n)
    flat = [a.reshape(-1) for a in inputs]
    if n_pad != n:
        flat = [jnp.pad(a, (0, n_pad - n)) for a in flat]
    flat2d = [a.reshape(rows, cols) for a in flat]

    tr = _row_tile(rows, cols, max_item, align)
    grid = (pl.cdiv(rows, tr),)
    spec = pl.BlockSpec((tr, cols), lambda i: (i, 0))
    # TODO(synk): once tiles are >=4 MiB, sweep pipeline_mode=pl.Buffered(3) on HW.

    out2d = pl.pallas_call(
        kernel,
        out_shape=jax.ShapeDtypeStruct((rows, cols), out_dtype),
        grid_spec=pltpu.PrefetchScalarGridSpec(
            num_scalar_prefetch=0,
            grid=grid,
            in_specs=[spec] * len(inputs),
            out_specs=spec,
        ),
        compiler_params=pltpu.CompilerParams(
            dimension_semantics=("parallel",),
            vmem_limit_bytes=_VMEM_LIMIT_BYTES,
        ),
    )(*flat2d)

    out_flat = out2d.reshape(-1)
    if n_pad != n:
        out_flat = out_flat[:n]
    return out_flat.reshape(shape)


# ---------------------------------------------------------------------------
# Public API
# ---------------------------------------------------------------------------

def residual_add(module_out, x, module_factor=1.0, input_factor=1.0):
    """Pallas-fused: module_out * module_factor + x * input_factor.

    Inputs stay in their native dtypes (no wrapper-side cast); the combine is
    computed in f32 in-kernel and stored in the promoted dtype (PyTorch-style
    type promotion).
    """
    assert module_out.shape == x.shape, (module_out.shape, x.shape)
    out_dtype = jnp.promote_types(module_out.dtype, x.dtype)
    kernel = functools.partial(
        _residual_add_kernel,
        module_factor=float(module_factor),
        input_factor=float(input_factor),
    )
    return _pallas_elementwise_call(kernel, [module_out, x], out_dtype)


def residual_fused_pointwise(x, module_fn, module_factor=1.0, input_factor=1.0):
    """Pallas-fused: module_fn(x) * module_factor + x * input_factor, module in-kernel.

    WARNING: `module_fn` MUST be strictly elementwise.  It is applied to a
    flattened, lane-dense (rows, cols) view of x, so anything shape-dependent
    (softmax/layernorm over an axis, convolutions, ...) would silently compute
    wrong results — use the generic path for those.
    """
    kernel = functools.partial(
        _residual_fused_kernel,
        module_fn=module_fn,
        module_factor=float(module_factor),
        input_factor=float(input_factor),
    )
    return _pallas_elementwise_call(kernel, [x], x.dtype)


class ResidualConnectionModule:
    """JAX/Pallas port of the PyTorch ResidualConnectionModule.

    forward(x) = module(x) * module_factor + x * input_factor

    `module` is any JAX callable (the arbitrary wrapped nn.Module).  If it is
    strictly pointwise/elementwise, set fuse_pointwise=True so it is evaluated
    inside the Pallas kernel, avoiding materializing module(x) to HBM.
    """

    def __init__(self, module, module_factor: float = 1.0, input_factor: float = 1.0,
                 fuse_pointwise: bool = False):
        self.module = module
        self.module_factor = float(module_factor)
        self.input_factor = float(input_factor)
        self.fuse_pointwise = fuse_pointwise

    def __call__(self, x):
        if self.fuse_pointwise:
            return residual_fused_pointwise(
                x, self.module, self.module_factor, self.input_factor)
        # TODO(synk): for matmul-like modules, the combine could instead be a
        # Pallas epilogue inside the module's own kernel (or left to XLA fusion),
        # saving one full read of module(x) (3N -> 2N bytes of HBM traffic).
        y = self.module(x)  # arbitrary wrapped submodule, runs as normal JAX
        return residual_add(y, x, self.module_factor, self.input_factor)


if __name__ == "__main__":
    key = jax.random.PRNGKey(0)
    # Small input consistent with a residual block: (batch=2, seq=8, hidden=32).
    x = jax.random.normal(key, (2, 8, 32), dtype=jnp.float32)

    # 1) Generic path: wrapped module is an arbitrary JAX callable (small linear
    #    projection); only the residual combine runs in the Pallas kernel.
    w = jax.random.normal(jax.random.PRNGKey(1), (32, 32), dtype=jnp.float32) * 0.1
    linear = lambda t: t @ w
    mod = ResidualConnectionModule(linear, module_factor=0.5, input_factor=1.0)
    y = mod(x)
    jax.block_until_ready(y)
    ref = linear(x) * 0.5 + x * 1.0
    assert y.shape == ref.shape, (y.shape, ref.shape)
    assert jnp.allclose(y, ref, atol=1e-5, rtol=1e-5), "residual_add mismatch"

    # 2) Fused pointwise path on bf16 input (exercises dtype-aware alignment and
    #    the in-kernel f32 combine + bf16 store).
    xb = x.astype(jnp.bfloat16)
    mod2 = ResidualConnectionModule(jnp.tanh, module_factor=0.5, input_factor=1.0,
                                    fuse_pointwise=True)
    y2 = mod2(xb)
    jax.block_until_ready(y2)
    ref2 = (jnp.tanh(xb).astype(jnp.float32) * 0.5
            + xb.astype(jnp.float32) * 1.0).astype(jnp.bfloat16)
    assert y2.dtype == jnp.bfloat16
    assert jnp.allclose(y2.astype(jnp.float32), ref2.astype(jnp.float32),
                        atol=1e-2, rtol=1e-2), "fused pointwise (bf16) mismatch"

    # 3) Mixed-dtype generic path: module emits f32, residual input is bf16 —
    #    cast happens in-kernel, combine in f32, output promoted to f32.
    mod3 = ResidualConnectionModule(lambda t: t.astype(jnp.float32) @ w,
                                    module_factor=0.5, input_factor=1.0)
    y3 = mod3(xb)
    jax.block_until_ready(y3)
    ref3 = (xb.astype(jnp.float32) @ w) * 0.5 + xb.astype(jnp.float32) * 1.0
    assert y3.dtype == jnp.float32
    assert jnp.allclose(y3, ref3, atol=1e-5, rtol=1e-5), "mixed-dtype residual mismatch"

    # 4) Non-128-divisible element count -> padded lane-dense path.
    x4 = jax.random.normal(jax.random.PRNGKey(2), (3, 5, 7), dtype=jnp.float32)
    mod4 = ResidualConnectionModule(jnp.tanh, module_factor=0.3, input_factor=0.7,
                                    fuse_pointwise=True)
    y4 = mod4(x4)
    jax.block_until_ready(y4)
    ref4 = jnp.tanh(x4) * 0.3 + x4 * 0.7
    assert jnp.allclose(y4, ref4, atol=1e-5, rtol=1e-5), "padded-path mismatch"

    print("KERNEL_OK")
</pallas_src>

<mosaic_0001>
module attributes {stable_mosaic.version = 11 : i64} {
  func.func @_residual_add_kernel(%arg0: i32, %arg1: memref<1x512xf32, #tpu.memory_space<vmem>>, %arg2: memref<1x512xf32, #tpu.memory_space<vmem>>, %arg3: memref<1x512xf32, #tpu.memory_space<vmem>>) attributes {dimension_semantics = [#tpu.dimension_semantics<parallel>], iteration_bounds = array<i64: 1>, scalar_prefetch = 0 : i64, scratch_operands = 0 : i64, tpu.core_type = #tpu.core_type<tc>, window_params = [{transform_indices = @transform_0, window_bounds = array<i64: 1, 512>}, {transform_indices = @transform_1, window_bounds = array<i64: 1, 512>}, {transform_indices = @transform_2, window_bounds = array<i64: 1, 512>}]} {
    %c0 = arith.constant 0 : index
    %c0_0 = arith.constant 0 : index
    %0 = vector.load %arg1[%c0, %c0_0] : memref<1x512xf32, #tpu.memory_space<vmem>>, vector<1x512xf32>
    %c0_1 = arith.constant 0 : index
    %c0_2 = arith.constant 0 : index
    %1 = vector.load %arg2[%c0_1, %c0_2] : memref<1x512xf32, #tpu.memory_space<vmem>>, vector<1x512xf32>
    %cst = arith.constant 5.000000e-01 : f32
    %2 = vector.broadcast %cst : f32 to vector<1x512xf32>
    %3 = arith.mulf %0, %2 : vector<1x512xf32>
    %cst_3 = arith.constant 1.000000e+00 : f32
    %4 = vector.broadcast %cst_3 : f32 to vector<1x512xf32>
    %5 = arith.mulf %1, %4 : vector<1x512xf32>
    %6 = arith.addf %3, %5 : vector<1x512xf32>
    %c0_4 = arith.constant 0 : index
    %c0_5 = arith.constant 0 : index
    %7 = vector.load %arg3[%c0_4, %c0_5] : memref<1x512xf32, #tpu.memory_space<vmem>>, vector<1x512xf32>
    tpu.vector_store %arg3[%c0_4, %c0_5], %6 {strides = array<i32>} : memref<1x512xf32, #tpu.memory_space<vmem>>, vector<1x512xf32>,
    return
  }
  func.func @transform_0(%arg0: i32) -> (i32, i32) {
    %c0_i32 = arith.constant 0 : i32
    %c0_i32_0 = arith.constant 0 : i32
    return %arg0, %c0_i32 : i32, i32
  }
  func.func @transform_1(%arg0: i32) -> (i32, i32) {
    %c0_i32 = arith.constant 0 : i32
    %c0_i32_0 = arith.constant 0 : i32
    return %arg0, %c0_i32 : i32, i32
  }
  func.func @transform_2(%arg0: i32) -> (i32, i32) {
    %c0_i32 = arith.constant 0 : i32
    %c0_i32_0 = arith.constant 0 : i32
    return %arg0, %c0_i32 : i32, i32
  }
}

</mosaic_0001>

<bundles_post_ra>
// kernel: tpu_custom_call.1
= control target key start
LH: loop header
LB: loop body
LE: loop exit
PB: predicated region body
PF: predicated region fallthrough
CT: control target
= control target key end

     0   :  { %7 = vsyncpa [#allocation3], 0  ;;  %s190_s0 = inlined_call_operand.hbm [shape: f32[1,512], index: 0, kind: input, shape index: {}]   ;;  %s191_s1 = inlined_call_operand.hbm [shape: f32[1,512], index: 1, kind: input, shape index: {}]   ;;  %s192_s2 = inlined_call_operand.hbm [shape: f32[1,512], index: 2, kind: output, shape index: {}]  }
   0x1   :  { %8 = vsyncpa [#allocation6], 0 }
   0x2   :  { %9 = vsyncpa [#allocation4], 0  ;;  %s136_s9 = smov [#allocation2]   ;;  %s137_s11 = smov [#allocation5]  }
   0x3   :  { %s16_s10 = sshll.u32 %s136_s9, 4  ;;  %s26_s12 = sshll.u32 %s137_s11, 4  ;;  %s17_s10 = int_to_ptr.vmem [resolvable:$true] %s16_s10  ;;  %s27_s12 = int_to_ptr.vmem [resolvable:$true] %s26_s12 }
   0x4   :  { %s64_s15 = scalar_lea.hbm %s190_s0, 64 }
   0x5   :  { %p65_p0 = scmp.ne.s32.totalorder %s190_s0, %s64_s15  ;;  %p68_p1 = scmp.lt.u32.totalorder %s64_s15, %s190_s0 }
   0x7   :  { %p70_p2 = pnand %p68_p1, %p65_p0 }
   0x9   :  { %73 = shalt.err (!%p70_p2)
}
   0xa   :  { %s74_s20 = scalar_lea.vmem %s17_s10, 64  ;;  %p79_p4 = scmp.lt.s32.totalorder %s17_s10, %s17_s10 }
   0xb   :  { %p75_p3 = scmp.ne.s32.totalorder %s17_s10, %s74_s20  ;;  %p80_p5 = scmp.lt.s32.totalorder %s74_s20, %s74_s20 }
   0xd   :  { %p81_p6 = por %p80_p5, %p79_p4 }
   0xf   :  { %p82_p7 = pnand %p81_p6, %p75_p3 }
  0x11   :  { %85 = shalt.err (!%p82_p7)
}
  0x12   :  { %19 = dma.hbm_to_vmem [thread:$0]  %s190_s0, 64, %s17_s10, [#allocation3]  }
  0x13   :  { %s86_s25 = scalar_lea.hbm %s191_s1, 64 }
  0x14   :  { %p87_p8 = scmp.ne.s32.totalorder %s191_s1, %s86_s25  ;;  %p90_p9 = scmp.lt.u32.totalorder %s86_s25, %s191_s1 }
  0x16   :  { %p92_p10 = pnand %p90_p9, %p87_p8 }
  0x18   :  { %95 = shalt.err (!%p92_p10)
}
  0x19   :  { %s96_s30 = scalar_lea.vmem %s27_s12, 64  ;;  %p101_p12 = scmp.lt.s32.totalorder %s27_s12, %s27_s12 }
  0x1a   :  { %p97_p11 = scmp.ne.s32.totalorder %s27_s12, %s96_s30  ;;  %p102_p13 = scmp.lt.s32.totalorder %s96_s30, %s96_s30 }
  0x1c   :  { %p103_p0 = por %p102_p13, %p101_p12 }
  0x1e   :  { %p104_p1 = pnand %p103_p0, %p97_p11 }
  0x20   :  { %107 = shalt.err (!%p104_p1)
}
  0x21   :  { %29 = dma.hbm_to_vmem [thread:$0]  %s191_s1, 64, %s27_s12, [#allocation6]  }
  0x22   :  { %130 = dma.done.wait [#allocation3], 64  }
  0x23   :  { %131 = vsyncadd [#allocation3], 4294967232 }
  0x24   :  { %132 = dma.done.wait [#allocation6], 64  }
  0x25   :  { %133 = vsyncadd [#allocation6], 4294967232  ;;  %v40_v0 = vlaneseq  ;;  %v36_v1 = vld [vmem:[#allocation2] sm:$0xf]  ;;  %v37_v2 = vld [vmem:[#allocation5] sm:$0xf] }
  0x26   :  { %s138_s4 = smov [#allocation7]   ;;  %v38_v3 = vmul.f32 0.5, %v36_v1 }
  0x27   :  { %s51_s5 = sshll.u32 %s138_s4, 4  ;;  %vm42_vm0 = vcmp.lt.s32.totalorder %v40_v0, 512  ;;  %s52_s5 = int_to_ptr.vmem [resolvable:$true] %s51_s5 }
  0x28   :  { %v39_v4 = vadd.f32 %v38_v3, %v37_v2  ;;  %s108_s6 = scalar_lea.vmem %s52_s5, 64  ;;  %p113_p3 = scmp.lt.s32.totalorder %s52_s5, %s52_s5 }
  0x29   :  { %p109_p2 = scmp.ne.s32.totalorder %s52_s5, %s108_s6  ;;  %p114_p4 = scmp.lt.s32.totalorder %s108_s6, %s108_s6 }
  0x2a   :  { %44 = vst.msk [vmem:[#allocation7] sm:$0xf] %vm42_vm0, %v39_v4 }
  0x2b   :  { %p115_p5 = por %p114_p4, %p113_p3 }
  0x2d   :  { %p116_p6 = pnand %p115_p5, %p109_p2 }
  0x2f   :  { %119 = shalt.err (!%p116_p6)
}
  0x30   :  { %s120_s8 = scalar_lea.hbm %s192_s2, 64 }
  0x31   :  { %p121_p7 = scmp.ne.s32.totalorder %s192_s2, %s120_s8  ;;  %p124_p8 = scmp.lt.u32.totalorder %s120_s8, %s192_s2 }
  0x33   :  { %p126_p9 = pnand %p124_p8, %p121_p7 }
  0x35   :  { %129 = shalt.err (!%p126_p9)
}
  0x36   :  { %54 = dma.vmem_to_hbm [thread:$0]  %s52_s5, 64, %s192_s2, [#allocation4]  }
  0x37   :  { %134 = dma.done.wait [#allocation4], 64  }
  0x38   :  { %135 = vsyncadd [#allocation4], 4294967232 }
  0x39   :  { %58 = vsyncpa [#allocation3], 1 }
  0x3a   :  { %59 = vsyncpa [#allocation6], 1 }
  0x3b   :  { %60 = vsyncpa [#allocation4], 1 }

</bundles_post_ra>
